<compile_context>
chip_gen: v6e
topology: v6e:2x2x1
jax: 0.10.0
libtpu: 0.0.40
codegen_flags: <defaults>
</compile_context>

<pallas_src>
import functools

import jax
import jax.numpy as jnp
from jax.experimental import pallas as pl
from jax.experimental.pallas import tpu as pltpu


LN_EPS = 1e-5   # PyTorch nn.LayerNorm default
H1 = 128        # first hidden width (already lane-dense)
HPAD = 128      # padded lane width for the expert/output dimension
MAX_TB = 2048   # batch-tile cap (few MB of VMEM even at 2048 rows)
NEG_BIG = -1e30  # finite "minus infinity" baked into padded expert lanes


def gate_kernel(xl_ref, xb_ref, w1l_ref, w1b_ref, vec_ref, w2_ref, w3_ref,
                o_ref, *, h2_dim):
    # Activations in bf16 for the MXU; accumulation stays f32.
    xl = xl_ref[...].astype(jnp.bfloat16)
    xb = xb_ref[...].astype(jnp.bfloat16)

    # Packed bias/affine vectors (single (8,128) f32 tile, one DMA stream).
    b1 = vec_ref[0:1, :]            # (1, 128)
    g = vec_ref[1:2, :]             # (1, 128)
    beta = vec_ref[2:3, :]          # (1, 128)
    b2 = vec_ref[3:4, :h2_dim]      # (1, 64)
    b3 = vec_ref[4:5, :]            # (1, 128), padded lanes already -1e30

    # Linear(input_dim, 128) as split matmul (concat fused away) + ReLU
    h1 = (jnp.dot(xl, w1l_ref[...], preferred_element_type=jnp.float32)
          + jnp.dot(xb, w1b_ref[...], preferred_element_type=jnp.float32)
          + b1)
    h1 = jnp.maximum(h1, 0.0)

    # LayerNorm(128), biased variance (matches PyTorch), single-pass moments:
    # the two reductions are independent and overlap on the XLU.
    inv_n = jnp.float32(1.0 / H1)
    mean = jnp.sum(h1, axis=-1, keepdims=True) * inv_n
    ex2 = jnp.sum(h1 * h1, axis=-1, keepdims=True) * inv_n
    var = ex2 - mean * mean
    h1n = (h1 - mean) * jax.lax.rsqrt(var + LN_EPS) * g + beta

    # Linear(128, 64) + ReLU  (last dim 64 == full array dim -> legal block)
    h2 = jnp.dot(h1n.astype(jnp.bfloat16), w2_ref[...],
                 preferred_element_type=jnp.float32) + b2
    h2 = jnp.maximum(h2, 0.0)

    # Linear(64, E) padded to 128 output lanes; expert mask is baked into b3,
    # so padded-lane logits are -1e30 and vanish under exp().
    logits = jnp.dot(h2.astype(jnp.bfloat16), w3_ref[...],
                     preferred_element_type=jnp.float32) + b3

    # Softmax(dim=-1): max-subtracted exp, EUP reciprocal for the normalize.
    m = jnp.max(logits, axis=-1, keepdims=True)
    e = jnp.exp(logits - m)
    denom = jnp.sum(e, axis=-1, keepdims=True)
    o_ref[...] = (e * pl.reciprocal(denom, approx=True)).astype(o_ref.dtype)


def prepare_params(params, lstm_dim):
    """One-time weight preprocessing:
       * split W1 for the fused concat, store matmul weights in bf16,
       * pack the five bias/affine vectors into one (8,128) f32 tile,
       * bake the padded-expert mask (-1e30) into the b3 row,
       * pad only W3's output dim (to 128 lanes); H2 stays 64."""
    w1, b1 = params["w1"], params["b1"]        # [input_dim, 128], [1, 128]
    w2, b2 = params["w2"], params["b2"]        # [128, 64],        [1, 64]
    w3, b3 = params["w3"], params["b3"]        # [64, E],          [1, E]
    h2 = w2.shape[1]
    num_experts = w3.shape[1]

    vecs = jnp.zeros((8, HPAD), jnp.float32)
    vecs = vecs.at[0, :H1].set(b1.reshape(-1))
    vecs = vecs.at[1, :H1].set(params["ln_g"].reshape(-1))
    vecs = vecs.at[2, :H1].set(params["ln_b"].reshape(-1))
    vecs = vecs.at[3, :h2].set(b2.reshape(-1))
    vecs = vecs.at[4, :].set(jnp.full((HPAD,), NEG_BIG, jnp.float32))
    vecs = vecs.at[4, :num_experts].set(b3.reshape(-1))

    w3p = jnp.zeros((h2, HPAD), jnp.float32).at[:, :num_experts].set(w3)

    return {
        "num_experts": num_experts,
        "h2": h2,
        "w1_lstm": w1[:lstm_dim].astype(jnp.bfloat16),
        "w1_bn": w1[lstm_dim:].astype(jnp.bfloat16),
        "w2": w2.astype(jnp.bfloat16),           # (128, 64)
        "w3p": w3p.astype(jnp.bfloat16),         # (64, 128)
        "vecs": vecs,                            # (8, 128) f32
    }


def bottleneck_aware_gate(lstm_features, bottleneck_vector, prep):
    """prep: output of prepare_params. Returns [B, num_experts] f32 probs."""
    B, Dl = lstm_features.shape
    Db = bottleneck_vector.shape[1]
    E = prep["num_experts"]
    h2 = prep["h2"]

    # Batch tile: one grid step for B <= 2048 (tb == full dim -> no alignment
    # padding, no wrapper-side jnp.pad); cap at 2048 rows for larger batches.
    tb = B if B <= MAX_TB else MAX_TB
    grid = (pl.cdiv(B, tb),)
    # TODO(synk): on v7x, an explicit 2-TC split (pltpu.CORE_PARALLEL /
    # pl.core_map) would shard multi-step grids across both TensorCores.

    def full(shape):
        return pl.BlockSpec(shape, lambda i: tuple(0 for _ in shape))

    weight_bytes = (2 * ((Dl + Db) * H1 + H1 * h2 + h2 * HPAD)   # bf16 weights
                    + 4 * 8 * HPAD)                              # packed vecs
    cost = pl.CostEstimate(
        flops=2 * B * ((Dl + Db) * H1 + H1 * h2 + h2 * HPAD),
        transcendentals=B * (HPAD + 2),                 # exp + rsqrt + recip
        bytes_accessed=weight_bytes + 4 * B * (Dl + Db) + 2 * B * HPAD,
    )

    out = pl.pallas_call(
        functools.partial(gate_kernel, h2_dim=h2),
        out_shape=jax.ShapeDtypeStruct((B, HPAD), jnp.bfloat16),
        grid_spec=pltpu.PrefetchScalarGridSpec(
            num_scalar_prefetch=0,
            grid=grid,
            in_specs=[
                pl.BlockSpec((tb, Dl), lambda i: (i, 0)),   # lstm features
                pl.BlockSpec((tb, Db), lambda i: (i, 0)),   # bottleneck vector
                full((Dl, H1)), full((Db, H1)),             # W1 split (bf16)
                full((8, HPAD)),                            # packed vectors
                full((H1, h2)),                             # W2 (bf16)
                full((h2, HPAD)),                           # W3 padded (bf16)
            ],
            out_specs=pl.BlockSpec((tb, HPAD), lambda i: (i, 0)),  # lane-dense
        ),
        compiler_params=pltpu.CompilerParams(
            dimension_semantics=("parallel",)),
        cost_estimate=cost,
    )(lstm_features, bottleneck_vector,
      prep["w1_lstm"], prep["w1_bn"], prep["vecs"], prep["w2"], prep["w3p"])

    return out[:, :E].astype(jnp.float32)


def init_params(key, input_dim, num_experts):
    """Deterministic init mimicking PyTorch nn.Linear default (Kaiming-uniform).
    Weights stored as [in, out] (x @ W + b == PyTorch x @ W.T + b)."""
    def linear(k, fan_in, fan_out):
        kw, kb = jax.random.split(k)
        bound = 1.0 / jnp.sqrt(fan_in)
        w = jax.random.uniform(kw, (fan_in, fan_out), jnp.float32, -bound, bound)
        b = jax.random.uniform(kb, (1, fan_out), jnp.float32, -bound, bound)
        return w, b

    k1, k2, k3 = jax.random.split(key, 3)
    w1, b1 = linear(k1, input_dim, H1)
    w2, b2 = linear(k2, H1, 64)
    w3, b3 = linear(k3, 64, num_experts)
    return {
        "w1": w1, "b1": b1,
        "ln_g": jnp.ones((1, H1), jnp.float32),
        "ln_b": jnp.zeros((1, H1), jnp.float32),
        "w2": w2, "b2": b2,
        "w3": w3, "b3": b3,
    }


def _reference(lstm_features, bottleneck_vector, p):
    x = jnp.concatenate([lstm_features, bottleneck_vector], axis=-1)
    h1 = jnp.maximum(x @ p["w1"] + p["b1"], 0.0)
    mu = jnp.mean(h1, -1, keepdims=True)
    var = jnp.mean((h1 - mu) ** 2, -1, keepdims=True)
    h1 = (h1 - mu) * jax.lax.rsqrt(var + LN_EPS) * p["ln_g"] + p["ln_b"]
    h2 = jnp.maximum(h1 @ p["w2"] + p["b2"], 0.0)
    logits = h2 @ p["w3"] + p["b3"]
    return jax.nn.softmax(logits, axis=-1)


if __name__ == "__main__":
    key = jax.random.PRNGKey(0)
    k_lstm, k_bn, k_p = jax.random.split(key, 3)

    batch = 8
    lstm_dim = 24
    bottleneck_dim = 8
    input_dim = lstm_dim + bottleneck_dim  # 32
    num_experts = 4

    lstm_features = jax.random.normal(k_lstm, (batch, lstm_dim), jnp.float32)
    bottleneck_vector = jax.random.normal(k_bn, (batch, bottleneck_dim), jnp.float32)
    params = init_params(k_p, input_dim, num_experts)
    prep = prepare_params(params, lstm_dim)   # one-time weight split / pack / bf16

    out = bottleneck_aware_gate(lstm_features, bottleneck_vector, prep)
    out = jax.block_until_ready(out)

    ref = _reference(lstm_features, bottleneck_vector, params)
    assert out.shape == (batch, num_experts)
    # bf16 matmul operands + bf16 output store + approx EUP reciprocal
    # -> slightly looser tolerance than exact f32 math.
    assert jnp.allclose(jnp.sum(out, -1), 1.0, atol=2e-2)
    assert jnp.allclose(out, ref, atol=2e-2, rtol=2e-2)

    print("KERNEL_OK")
</pallas_src>

<mosaic_0001>
module attributes {stable_mosaic.version = 11 : i64} {
  func.func @gate_kernel(%arg0: i32, %arg1: memref<8x24xf32, #tpu.memory_space<vmem>>, %arg2: memref<8x8xf32, #tpu.memory_space<vmem>>, %arg3: memref<24x128xbf16, #tpu.memory_space<vmem>>, %arg4: memref<8x128xbf16, #tpu.memory_space<vmem>>, %arg5: memref<8x128xf32, #tpu.memory_space<vmem>>, %arg6: memref<128x64xbf16, #tpu.memory_space<vmem>>, %arg7: memref<64x128xbf16, #tpu.memory_space<vmem>>, %arg8: memref<8x128xbf16, #tpu.memory_space<vmem>>) attributes {dimension_semantics = [#tpu.dimension_semantics<parallel>], iteration_bounds = array<i64: 1>, scalar_prefetch = 0 : i64, scratch_operands = 0 : i64, tpu.core_type = #tpu.core_type<tc>, window_params = [{transform_indices = @transform_0, window_bounds = array<i64: 8, 24>}, {transform_indices = @transform_1, window_bounds = array<i64: 8, 8>}, {pipeline_mode = #tpu.pipeline_mode<synchronous>, transform_indices = @transform_2, window_bounds = array<i64: 24, 128>}, {pipeline_mode = #tpu.pipeline_mode<synchronous>, transform_indices = @transform_3, window_bounds = array<i64: 8, 128>}, {pipeline_mode = #tpu.pipeline_mode<synchronous>, transform_indices = @transform_4, window_bounds = array<i64: 8, 128>}, {pipeline_mode = #tpu.pipeline_mode<synchronous>, transform_indices = @transform_5, window_bounds = array<i64: 128, 64>}, {pipeline_mode = #tpu.pipeline_mode<synchronous>, transform_indices = @transform_6, window_bounds = array<i64: 64, 128>}, {transform_indices = @transform_7, window_bounds = array<i64: 8, 128>}]} {
    %c0 = arith.constant 0 : index
    %c0_0 = arith.constant 0 : index
    %0 = vector.load %arg1[%c0, %c0_0] : memref<8x24xf32, #tpu.memory_space<vmem>>, vector<8x24xf32>
    %1 = arith.truncf %0 : vector<8x24xf32> to vector<8x24xbf16>
    %c0_1 = arith.constant 0 : index
    %c0_2 = arith.constant 0 : index
    %2 = vector.load %arg2[%c0_1, %c0_2] : memref<8x8xf32, #tpu.memory_space<vmem>>, vector<8x8xf32>
    %3 = arith.truncf %2 : vector<8x8xf32> to vector<8x8xbf16>
    %c0_3 = arith.constant 0 : index
    %c0_4 = arith.constant 0 : index
    %4 = vector.load %arg5[%c0_3, %c0_4] : memref<8x128xf32, #tpu.memory_space<vmem>>, vector<1x128xf32>
    %c1 = arith.constant 1 : index
    %c0_5 = arith.constant 0 : index
    %5 = vector.load %arg5[%c1, %c0_5] : memref<8x128xf32, #tpu.memory_space<vmem>>, vector<1x128xf32>
    %c2 = arith.constant 2 : index
    %c0_6 = arith.constant 0 : index
    %6 = vector.load %arg5[%c2, %c0_6] : memref<8x128xf32, #tpu.memory_space<vmem>>, vector<1x128xf32>
    %c3 = arith.constant 3 : index
    %c0_7 = arith.constant 0 : index
    %7 = vector.load %arg5[%c3, %c0_7] : memref<8x128xf32, #tpu.memory_space<vmem>>, vector<1x64xf32>
    %c4 = arith.constant 4 : index
    %c0_8 = arith.constant 0 : index
    %8 = vector.load %arg5[%c4, %c0_8] : memref<8x128xf32, #tpu.memory_space<vmem>>, vector<1x128xf32>
    %c0_9 = arith.constant 0 : index
    %c0_10 = arith.constant 0 : index
    %9 = vector.load %arg3[%c0_9, %c0_10] : memref<24x128xbf16, #tpu.memory_space<vmem>>, vector<24x128xbf16>
    %cst = arith.constant dense<0.000000e+00> : vector<8x128xf32>
    %10 = tpu.matmul %1, %9, %cst {dimension_numbers = #tpu.dot_dimension_numbers<[1], [0], [0], [1], [0, 0, 1, 1], [], []>} : vector<8x24xbf16>, vector<24x128xbf16>, vector<8x128xf32> -> vector<8x128xf32>
    %c0_11 = arith.constant 0 : index
    %c0_12 = arith.constant 0 : index
    %11 = vector.load %arg4[%c0_11, %c0_12] : memref<8x128xbf16, #tpu.memory_space<vmem>>, vector<8x128xbf16>
    %cst_13 = arith.constant dense<0.000000e+00> : vector<8x128xf32>
    %12 = tpu.matmul %3, %11, %cst_13 {dimension_numbers = #tpu.dot_dimension_numbers<[1], [0], [0], [1], [0, 0, 1, 1], [], []>} : vector<8x8xbf16>, vector<8x128xbf16>, vector<8x128xf32> -> vector<8x128xf32>
    %13 = arith.addf %10, %12 : vector<8x128xf32>
    %14 = vector.broadcast %4 : vector<1x128xf32> to vector<8x128xf32>
    %15 = arith.addf %13, %14 : vector<8x128xf32>
    %cst_14 = arith.constant 0.000000e+00 : f32
    %16 = vector.broadcast %cst_14 : f32 to vector<8x128xf32>
    %17 = arith.maximumf %15, %16 : vector<8x128xf32>
    %cst_15 = arith.constant dense<0.000000e+00> : vector<8xf32>
    %18 = vector.multi_reduction <add>, %17, %cst_15 [1] : vector<8x128xf32> to vector<8xf32>
    %19 = vector.shape_cast %18 : vector<8xf32> to vector<8x1xf32>
    %cst_16 = arith.constant 7.812500e-03 : f32
    %20 = vector.broadcast %cst_16 : f32 to vector<8x1xf32>
    %21 = arith.mulf %19, %20 : vector<8x1xf32>
    %22 = arith.mulf %17, %17 : vector<8x128xf32>
    %cst_17 = arith.constant dense<0.000000e+00> : vector<8xf32>
    %23 = vector.multi_reduction <add>, %22, %cst_17 [1] : vector<8x128xf32> to vector<8xf32>
    %24 = vector.shape_cast %23 : vector<8xf32> to vector<8x1xf32>
    %cst_18 = arith.constant 7.812500e-03 : f32
    %25 = vector.broadcast %cst_18 : f32 to vector<8x1xf32>
    %26 = arith.mulf %24, %25 : vector<8x1xf32>
    %27 = arith.mulf %21, %21 : vector<8x1xf32>
    %28 = arith.subf %26, %27 : vector<8x1xf32>
    %29 = vector.broadcast %21 : vector<8x1xf32> to vector<8x128xf32>
    %30 = arith.subf %17, %29 : vector<8x128xf32>
    %cst_19 = arith.constant 9.99999974E-6 : f32
    %31 = vector.broadcast %cst_19 : f32 to vector<8x1xf32>
    %32 = arith.addf %28, %31 : vector<8x1xf32>
    %33 = math.rsqrt %32 : vector<8x1xf32>
    %34 = vector.broadcast %33 : vector<8x1xf32> to vector<8x128xf32>
    %35 = arith.mulf %30, %34 : vector<8x128xf32>
    %36 = vector.broadcast %5 : vector<1x128xf32> to vector<8x128xf32>
    %37 = arith.mulf %35, %36 : vector<8x128xf32>
    %38 = vector.broadcast %6 : vector<1x128xf32> to vector<8x128xf32>
    %39 = arith.addf %37, %38 : vector<8x128xf32>
    %40 = arith.truncf %39 : vector<8x128xf32> to vector<8x128xbf16>
    %c0_20 = arith.constant 0 : index
    %c0_21 = arith.constant 0 : index
    %41 = vector.load %arg6[%c0_20, %c0_21] : memref<128x64xbf16, #tpu.memory_space<vmem>>, vector<128x64xbf16>
    %cst_22 = arith.constant dense<0.000000e+00> : vector<8x64xf32>
    %42 = tpu.matmul %40, %41, %cst_22 {dimension_numbers = #tpu.dot_dimension_numbers<[1], [0], [0], [1], [0, 0, 1, 1], [], []>} : vector<8x128xbf16>, vector<128x64xbf16>, vector<8x64xf32> -> vector<8x64xf32>
    %43 = vector.broadcast %7 : vector<1x64xf32> to vector<8x64xf32>
    %44 = arith.addf %42, %43 : vector<8x64xf32>
    %cst_23 = arith.constant 0.000000e+00 : f32
    %45 = vector.broadcast %cst_23 : f32 to vector<8x64xf32>
    %46 = arith.maximumf %44, %45 : vector<8x64xf32>
    %47 = arith.truncf %46 : vector<8x64xf32> to vector<8x64xbf16>
    %c0_24 = arith.constant 0 : index
    %c0_25 = arith.constant 0 : index
    %48 = vector.load %arg7[%c0_24, %c0_25] : memref<64x128xbf16, #tpu.memory_space<vmem>>, vector<64x128xbf16>
    %cst_26 = arith.constant dense<0.000000e+00> : vector<8x128xf32>
    %49 = tpu.matmul %47, %48, %cst_26 {dimension_numbers = #tpu.dot_dimension_numbers<[1], [0], [0], [1], [0, 0, 1, 1], [], []>} : vector<8x64xbf16>, vector<64x128xbf16>, vector<8x128xf32> -> vector<8x128xf32>
    %50 = vector.broadcast %8 : vector<1x128xf32> to vector<8x128xf32>
    %51 = arith.addf %49, %50 : vector<8x128xf32>
    %cst_27 = arith.constant dense<0xFF800000> : vector<8xf32>
    %52 = vector.multi_reduction <maximumf>, %51, %cst_27 [1] : vector<8x128xf32> to vector<8xf32>
    %53 = vector.shape_cast %52 : vector<8xf32> to vector<8x1xf32>
    %54 = vector.broadcast %53 : vector<8x1xf32> to vector<8x128xf32>
    %55 = arith.subf %51, %54 : vector<8x128xf32>
    %56 = math.exp %55 : vector<8x128xf32>
    %cst_28 = arith.constant dense<0.000000e+00> : vector<8xf32>
    %57 = vector.multi_reduction <add>, %56, %cst_28 [1] : vector<8x128xf32> to vector<8xf32>
    %58 = vector.shape_cast %57 : vector<8xf32> to vector<8x1xf32>
    %59 = tpu.reciprocal %58 {approx = true} : vector<8x1xf32> -> vector<8x1xf32>
    %60 = vector.broadcast %59 : vector<8x1xf32> to vector<8x128xf32>
    %61 = arith.mulf %56, %60 : vector<8x128xf32>
    %62 = arith.truncf %61 : vector<8x128xf32> to vector<8x128xbf16>
    %c0_29 = arith.constant 0 : index
    %c0_30 = arith.constant 0 : index
    %63 = vector.load %arg8[%c0_29, %c0_30] : memref<8x128xbf16, #tpu.memory_space<vmem>>, vector<8x128xbf16>
    tpu.vector_store %arg8[%c0_29, %c0_30], %62 {strides = array<i32>} : memref<8x128xbf16, #tpu.memory_space<vmem>>, vector<8x128xbf16>,
    return
  }
  func.func @transform_0(%arg0: i32) -> (i32, i32) {
    %c0_i32 = arith.constant 0 : i32
    %c0_i32_0 = arith.constant 0 : i32
    return %arg0, %c0_i32 : i32, i32
  }
  func.func @transform_1(%arg0: i32) -> (i32, i32) {
    %c0_i32 = arith.constant 0 : i32
    %c0_i32_0 = arith.constant 0 : i32
    return %arg0, %c0_i32 : i32, i32
  }
  func.func @transform_2(%arg0: i32) -> (i32, i32) {
    %c0_i32 = arith.constant 0 : i32
    %c0_i32_0 = arith.constant 0 : i32
    %c0_i32_1 = arith.constant 0 : i32
    return %c0_i32, %c0_i32_0 : i32, i32
  }
  func.func @transform_3(%arg0: i32) -> (i32, i32) {
    %c0_i32 = arith.constant 0 : i32
    %c0_i32_0 = arith.constant 0 : i32
    %c0_i32_1 = arith.constant 0 : i32
    return %c0_i32, %c0_i32_0 : i32, i32
  }
  func.func @transform_4(%arg0: i32) -> (i32, i32) {
    %c0_i32 = arith.constant 0 : i32
    %c0_i32_0 = arith.constant 0 : i32
    %c0_i32_1 = arith.constant 0 : i32
    return %c0_i32, %c0_i32_0 : i32, i32
  }
  func.func @transform_5(%arg0: i32) -> (i32, i32) {
    %c0_i32 = arith.constant 0 : i32
    %c0_i32_0 = arith.constant 0 : i32
    %c0_i32_1 = arith.constant 0 : i32
    return %c0_i32, %c0_i32_0 : i32, i32
  }
  func.func @transform_6(%arg0: i32) -> (i32, i32) {
    %c0_i32 = arith.constant 0 : i32
    %c0_i32_0 = arith.constant 0 : i32
    %c0_i32_1 = arith.constant 0 : i32
    return %c0_i32, %c0_i32_0 : i32, i32
  }
  func.func @transform_7(%arg0: i32) -> (i32, i32) {
    %c0_i32 = arith.constant 0 : i32
    %c0_i32_0 = arith.constant 0 : i32
    return %arg0, %c0_i32 : i32, i32
  }
}

</mosaic_0001>

<bundles_post_ra>
// kernel: tpu_custom_call.1
= control target key start
LH: loop header
LB: loop body
LE: loop exit
PB: predicated region body
PF: predicated region fallthrough
CT: control target
= control target key end

     0   :  { %vm45_vm0 = vcmask 1043456   ;;  %v522_v1 = vmov 0.0   ;;  %vm523_vm1 = vmmov 0   ;;  %vm41_vm2 = vcmask 64512   ;;  %s657_s0 = inlined_call_operand.vmem [shape: f32[8,24], index: 0, kind: input, shape index: {}]   ;;  %s658_s1 = inlined_call_operand.vmem [shape: f32[8,8], index: 1, kind: input, shape index: {}]   ;;  %s659_s2 = inlined_call_operand.vmem [shape: bf16[24,128], index: 2, kind: input, shape index: {}]   ;;  %s660_s3 = inlined_call_operand.vmem [shape: bf16[8,128], index: 3, kind: input, shape index: {}]   ;;  %s661_s4 = inlined_call_operand.vmem [shape: f32[8,128], index: 4, kind: input, shape index: {}]   ;;  %s662_s5 = inlined_call_operand.vmem [shape: bf16[128,64], index: 5, kind: input, shape index: {}]   ;;  %s663_s6 = inlined_call_operand.vmem [shape: bf16[64,128], index: 6, kind: input, shape index: {}]   ;;  %s664_s7 = inlined_call_operand.hbm [shape: bf16[8,128], index: 7, kind: output, shape index: {}]  }
   0x1   :  { %v40_v0 = vld [vmem:[%s660_s3] sm:$0xf]  ;;  %431 = vmatprep.subr.bf16.mxu1 %v522_v1  ;;  %v480_v3 = vld [vmem:[%s659_s2 + $0x8] ss:$0 sps:$4 sm:$0xff]   ;;  %445 = vmatprep.subr.bf16.mxu0 %v522_v1  ;;  %vm98_vm3 = vcmask 195584  }
   0x2   :  { %v47_v2 = vsel %vm45_vm0, %v40_v0, 0  ;;  %v30_v4 = vld [vmem:[%s658_s1] sm:$0xff]  ;;  %433 = vmatprep.mubr.msk.bf16.mxu1 %vm523_vm1, %v522_v1  ;;  %v103_v6 = vsel %vm45_vm0, %v480_v3, 0  ;;  %461 = vmatprep.mubr.msk.bf16.mxu0 %vm523_vm1, %v522_v1 }
   0x3   :  { %432 = vmatpush3.bf16.msra.mxu1 %v47_v2  ;;  %v31_v5 = vpack.c.bf16 %v30_v4, %v30_v4  ;;  %v481_v7 = vld [vmem:[%s659_s2] sm:$0xff]  }
   0x4   :  { %437 = vmatprep.subr.bf16.mxu1 %v522_v1  ;;  %v28_v8 = vld [vmem:[%s657_s0] sm:$0xff] }
   0x5   :  { %v29_v9 = vpack.c.bf16 %v28_v8, %v28_v8 }
   0x6   :  { %434 = vmatmul.mubr.msk.bf16.vlgmr.msra.gmra.mxu1 %vm41_vm2, %v31_v5 }
   0x7   :  { %438 = vmatpush3.bf16.msra.mxu1 %v103_v6  ;;  %441 = vmatprep.mubr.msk.bf16.mxu1 %vm523_vm1, %v522_v1 }
   0x8   :  { %439 = vmatprep.subr.bf16.mxu1 %v522_v1 }
   0xb   :  { %440 = vmatpush3.bf16.msra.mxu1 %v481_v7 }
   0xc   :  { %465 = vmatprep.subr.bf16.mxu1 %v522_v1 }
   0xd   :  { %12 = vsyncpa [#allocation3], 0  ;;  %v394_v14 = vld [vmem:[%s661_s4] ss:$0 sm:$0xff]  ;;  %v482_v23 = vld [vmem:[%s662_s5 + $0x38] sm:$0xff]   ;;  %vm321_vm4 = vcmask 523264  }
   0xe   :  { %442 = vmatmul.mubr.msk.bf16.vlgmr.msra.gmra.mxu1 %vm98_vm3, %v29_v9  ;;  %446 = vmatpush3.bf16.msra.mxu0 %v482_v23  ;;  %v483_v24 = vld [vmem:[%s662_s5 + $0x30] sm:$0xff]   ;;  %v484_v25 = vld [vmem:[%s662_s5 + $0x28] sm:$0xff]   ;;  %v485_v26 = vld [vmem:[%s662_s5 + $0x20] sm:$0xff]  }
   0xf   :  { %473 = vmatprep.mubr.msk.bf16.mxu1 %vm523_vm1, %v522_v1  ;;  %447 = vmatprep.subr.bf16.mxu0 %v522_v1  ;;  %v486_v27 = vld [vmem:[%s662_s5 + $0x18] sm:$0xff]   ;;  %v487_v28 = vld [vmem:[%s662_s5 + $0x10] sm:$0xff]   ;;  %v488_v29 = vld [vmem:[%s662_s5 + $0x8] sm:$0xff]  }
  0x10   :  { %v489_v30 = vld [vmem:[%s662_s5] sm:$0xff]   ;;  %v490_v31 = vld [vmem:[%s663_s6 + $0x18] sm:$0xff]   ;;  %v491_v32 = vld [vmem:[%s663_s6 + $0x10] sm:$0xff]  }
  0x11   :  { %466 = vmatpush3.bf16.msra.mxu1 %v490_v31  ;;  %v395_v42 = vld [vmem:[%s661_s4 + $0x1] ss:$0 sm:$0xff]  ;;  %v396_v44 = vld [vmem:[%s661_s4 + $0x2] ss:$0 sm:$0xff]  ;;  %v492_v48 = vld [vmem:[%s663_s6 + $0x8] sm:$0xff]  }
  0x12   :  { %448 = vmatpush3.bf16.msra.mxu0 %v483_v24  ;;  %467 = vmatprep.subr.bf16.mxu1 %v522_v1  ;;  %v493_v49 = vld [vmem:[%s663_s6] sm:$0xff]   ;;  %s524_s6 = smov [#allocation2]  }
  0x13   :  { %449 = vmatprep.subr.bf16.mxu0 %v522_v1  ;;  %v397_v50 = vld [vmem:[%s661_s4 + $0x3] ss:$0 sm:$0xff]  ;;  %v406_v58 = vld [vmem:[%s661_s4 + $0x4] ss:$0 sm:$0xff]  ;;  %s382_s13 = sshll.u32 %s524_s6, 4  ;;  %s383_s13 = int_to_ptr.vmem [resolvable:$true] %s382_s13 }
  0x14   :  { %s500_s4 = scalar_lea.vmem %s383_s13, 64  ;;  %p505_p1 = scmp.lt.s32.totalorder %s383_s13, %s383_s13 }
  0x15   :  { %468 = vmatpush3.bf16.msra.mxu1 %v491_v32  ;;  %p501_p0 = scmp.ne.s32.totalorder %s383_s13, %s500_s4  ;;  %p506_p2 = scmp.lt.s32.totalorder %s500_s4, %s500_s4 }
  0x16   :  { %450 = vmatpush3.bf16.msra.mxu0 %v484_v25  ;;  %469 = vmatprep.subr.bf16.mxu1 %v522_v1 }
  0x17   :  { %451 = vmatprep.subr.bf16.mxu0 %v522_v1  ;;  %p507_p3 = por %p506_p2, %p505_p1 }
  0x19   :  { %470 = vmatpush3.bf16.msra.mxu1 %v492_v48  ;;  %p508_p4 = pnand %p507_p3, %p501_p0 }
  0x1a   :  { %452 = vmatpush3.bf16.msra.mxu0 %v485_v26  ;;  %471 = vmatprep.subr.bf16.mxu1 %v522_v1 }
  0x1b   :  { %453 = vmatprep.subr.bf16.mxu0 %v522_v1 }
  0x1d   :  { %472 = vmatpush3.bf16.msra.mxu1 %v493_v49 }
  0x1e   :  { %454 = vmatpush3.bf16.msra.mxu0 %v486_v27 }
  0x1f   :  { %455 = vmatprep.subr.bf16.mxu0 %v522_v1 }
  0x22   :  { %456 = vmatpush3.bf16.msra.mxu0 %v487_v28 }
  0x23   :  { %457 = vmatprep.subr.bf16.mxu0 %v522_v1 }
  0x26   :  { %458 = vmatpush3.bf16.msra.mxu0 %v488_v29 }
  0x27   :  { %459 = vmatprep.subr.bf16.mxu0 %v522_v1 }
  0x2a   :  { %460 = vmatpush3.bf16.msra.mxu0 %v489_v30 }
  0xc6   :  { %v83_v10 = vpop.f32.mrf.mxu1 }
  0xc8   :  { %v435_v11 = vpop.f32.mrf.mxu1 }
  0xca   :  { %v86_v12 = vpop.f32.mrf.mxu1 }
  0xcc   :  { %v436_v13 = vpop.f32.mrf.mxu1 }
  0xce   :  { %v139_v15 = vpop.f32.mrf.mxu1 }
  0xcf   :  { %v140_v16 = vadd.f32 %v139_v15, %v83_v10 }
  0xd0   :  { %v443_v17 = vpop.f32.mrf.mxu1 }
  0xd1   :  { %v149_v18 = vadd.f32 %v394_v14, %v140_v16 }
  0xd2   :  { %v142_v19 = vpop.f32.mrf.mxu1 }
  0xd3   :  { %v150_v20 = vmax.f32 %v149_v18, 0.0 }
  0xd4   :  { %v444_v21 = vpop.f32.mrf.mxu1 }
  0xd5   :  { %151 = vadd.xlane.f32.xlu0 %v150_v20  ;;  %v154_v22 = vmul.f32 %v150_v20, %v150_v20 }
  0xd9   :  { %155 = vadd.xlane.f32.xlu0 %v154_v22 }
 0x15e   :  { %v152_v33 = vpop.xlane.xlu0 %151 }
 0x15f   :  { %v153_v34 = vmul.f32 0.0078125, %v152_v33 }
 0x161   :  { %v158_v36 = vmul.f32 %v153_v34, %v153_v34  ;;  %v160_v40 = vsub.f32 %v150_v20, %v153_v34 }
 0x162   :  { %v156_v35 = vpop.xlane.xlu0 %155 }
 0x163   :  { %v157_v37 = vmul.f32 0.0078125, %v156_v35 }
 0x165   :  { %v159_v38 = vsub.f32 %v157_v37, %v158_v36 }
 0x167   :  { %v161_v39 = vadd.f32 1e-05, %v159_v38 }
 0x169   :  { %494 = vrsqrt.f32 %v161_v39 }
 0x176   :  { %v495_v41 = vpop.eup %494 }
 0x177   :  { %v163_v43 = vmul.f32 %v495_v41, %v160_v40 }
 0x179   :  { %v168_v45 = vmul.f32 %v395_v42, %v163_v43 }
 0x17b   :  { %v173_v46 = vadd.f32 %v396_v44, %v168_v45 }
 0x17d   :  { %v174_v47 = vpack.c.bf16 %v173_v46, %v173_v46 }
 0x17f   :  { %462 = vmatmul.mubr.bf16.vlgmr.msra.gmra.mxu0 %v174_v47 }
 0x23f   :  { %v277_v51 = vpop.f32.mrf.mxu0 }
 0x240   :  { %v278_v52 = vadd.f32 %v397_v50, %v277_v51 }
 0x241   :  { %v463_v53 = vpop.f32.mrf.mxu0 }
 0x242   :  { %v283_v54 = vmax.f32 %v278_v52, 0.0 }
 0x243   :  { %v280_v55 = vpop.f32.mrf.mxu0 }
 0x244   :  { %v284_v56 = vpack.c.bf16 %v283_v54, %v283_v54 }
 0x245   :  { %v464_v57 = vpop.f32.mrf.mxu0 }
 0x246   :  { %474 = vmatmul.mubr.msk.bf16.vlgmr.msra.gmra.mxu1 %vm321_vm4, %v284_v56 }
 0x306   :  { %v359_v59 = vpop.f32.mrf.mxu1 }
 0x307   :  { %v360_v60 = vadd.f32 %v406_v58, %v359_v59 }
 0x308   :  { %v475_v61 = vpop.f32.mrf.mxu1 }
 0x309   :  { %365 = vmax.xlane.f32.xlu1 %v360_v60 }
 0x30a   :  { %v362_v62 = vpop.f32.mrf.mxu1 }
 0x30c   :  { %v476_v63 = vpop.f32.mrf.mxu1 }
 0x392   :  { %v366_v0 = vpop.xlane.xlu1 %365 }
 0x393   :  { %v367_v1 = vsub.f32 %v360_v60, %v366_v0 }
 0x395   :  { %v368_v2 = vmul.f32 1.442695, %v367_v1 }
 0x397   :  { %496 = vpow2.f32 %v368_v2 }
 0x3a4   :  { %v497_v3 = vpop.eup %496 }
 0x3a5   :  { %370 = vadd.xlane.f32.xlu1 %v497_v3 }
 0x42e   :  { %v371_v4 = vpop.xlane.xlu1 %370 }
 0x42f   :  { %498 = vrcp.f32 %v371_v4 }
 0x43c   :  { %v499_v5 = vpop.eup %498 }
 0x43d   :  { %v373_v6 = vmul.f32 %v499_v5, %v497_v3 }
 0x43f   :  { %v374_v7 = vpack.c.bf16 %v373_v6, %v373_v6 }
 0x441   :  { %375 = vst [vmem:[#allocation2] sm:$0xf] %v374_v7 }
 0x442   :  { %511 = shalt.err (!%p508_p4)
}
 0x443   :  { %385 = dma.vmem_to_hbm [thread:$0]  %s383_s13, 64, %s664_s7, [#allocation3]  }
 0x444   :  { %520 = dma.done.wait [#allocation3], 64  }
 0x445   :  { %521 = vsyncadd [#allocation3], 4294967232 }
 0x446   :  { %389 = vsyncpa [#allocation3], 1 }

</bundles_post_ra>
